<compile_context>
chip_gen: v5e
topology: v5e:2x2
jax: 0.10.0
libtpu: 0.0.40
codegen_flags: <defaults>
</compile_context>

<pallas_src>
import functools

import jax
import jax.numpy as jnp
from jax import lax
from jax.experimental import pallas as pl
from jax.experimental.pallas import tpu as pltpu


def actor_critic_kernel(x_ref, w1_ref, b1_ref, w2_ref, b2_ref,
                        probs_out_ref, value_out_ref, *, num_actions):
    # fused first layer (critic || actor): one (Bt, K) @ (K, 2H) MXU pass
    # bf16 operands, f32 accumulation; bias add + ReLU in f32 on the VPU.
    x = x_ref[...].astype(jnp.bfloat16)
    h = jnp.dot(x, w1_ref[...], preferred_element_type=jnp.float32) + b1_ref[...]
    h = jnp.maximum(h, 0.0)

    # fused second layer: one (Bt, 2H) @ (2H, 128) MXU pass
    #   z[:, :A] = actor logits,  z[:, A] = critic value,  z[:, A+1:] = 0
    z = jnp.dot(h.astype(jnp.bfloat16), w2_ref[...],
                preferred_element_type=jnp.float32) + b2_ref[...]

    col = lax.broadcasted_iota(jnp.int32, z.shape, 1)
    is_logit = col < num_actions

    # softmax over the logit columns only (value column + padding masked out),
    # all in f32.  Exact divide so probabilities sum to 1.
    lm = jnp.where(is_logit, z, jnp.float32(-1e30))
    m = jnp.max(lm, axis=1, keepdims=True)
    e = jnp.exp(lm - m)                      # masked cols -> 0
    s = jnp.sum(e, axis=1, keepdims=True)
    probs = e / s                            # exact; masked cols stay 0

    # lane-dense bf16 probs slab (padding columns are already zero) and a
    # separate tiny f32 value output.
    probs_out_ref[...] = probs.astype(probs_out_ref.dtype)
    value_out_ref[...] = z[:, num_actions:num_actions + 1].astype(
        value_out_ref.dtype)


def pack_params(wc1, bc1, wc2, bc2, wa1, ba1, wa2, ba2, lane_pad=128):
    """Fuse per-head weights into two MXU-friendly operands.

    Returns (w1, b1, w2, b2):
      w1: (K, 2H)  bf16 = [wc1 | wa1]
      b1: (1, 2H)  f32  = [bc1 | ba1]
      w2: (2H, NP) bf16, block-structured: cols 0..A-1 <- wa2 (rows H:2H),
                   col A <- wc2 (rows 0:H), rest zero.  NP = 128-padded lanes.
      b2: (1, NP)  f32, matching biases, zero in padded columns.
    """
    H = wc1.shape[1]
    A = wa2.shape[1]
    np_lanes = max(((A + 1 + lane_pad - 1) // lane_pad) * lane_pad, lane_pad)

    w1 = jnp.concatenate([wc1, wa1], axis=1).astype(jnp.bfloat16)
    b1 = jnp.concatenate([bc1, ba1], axis=1).astype(jnp.float32)

    w2 = jnp.zeros((2 * H, np_lanes), jnp.float32)
    w2 = w2.at[H:, :A].set(wa2)          # actor second layer -> logit columns
    w2 = w2.at[:H, A].set(wc2[:, 0])     # critic second layer -> value column
    w2 = w2.astype(jnp.bfloat16)

    b2 = jnp.zeros((1, np_lanes), jnp.float32)
    b2 = b2.at[0, :A].set(ba2[0])
    b2 = b2.at[0, A].set(bc2[0, 0])
    return w1, b1, w2, b2


def actor_critic_forward(x, fused_params, num_outputs, *, block_batch=2048):
    """Returns (probs (B, A) bf16, value (B, 1) f32) — same forward math as
    the torch module."""
    w1, b1, w2, b2 = fused_params
    B, K = x.shape
    H2 = w1.shape[1]
    NP = w2.shape[1]

    bt = min(block_batch, B)
    grid = (pl.cdiv(B, bt),)   # ragged last block is fine: per-row compute only

    probs_slab, value = pl.pallas_call(
        functools.partial(actor_critic_kernel, num_actions=num_outputs),
        out_shape=(jax.ShapeDtypeStruct((B, NP), jnp.bfloat16),
                   jax.ShapeDtypeStruct((B, 1), jnp.float32)),
        grid_spec=pltpu.PrefetchScalarGridSpec(
            num_scalar_prefetch=0,
            grid=grid,
            in_specs=[
                pl.BlockSpec((bt, K), lambda i: (i, 0)),    # x tile, pipelined
                pl.BlockSpec((K, H2), lambda i: (0, 0)),    # weights: VMEM-resident
                pl.BlockSpec((1, H2), lambda i: (0, 0)),
                pl.BlockSpec((H2, NP), lambda i: (0, 0)),
                pl.BlockSpec((1, NP), lambda i: (0, 0)),
            ],
            out_specs=[
                pl.BlockSpec((bt, NP), lambda i: (i, 0)),   # bf16 probs slab
                pl.BlockSpec((bt, 1), lambda i: (i, 0)),    # f32 value
            ],
        ),
        compiler_params=pltpu.CompilerParams(
            dimension_semantics=("parallel",)),  # shards across v7x's 2 TCs
    )(x, w1, b1, w2, b2)

    probs = probs_slab[:, :num_outputs]
    return probs, value


def init_linear(key, fan_in, fan_out):
    """PyTorch-style uniform init U(-1/sqrt(fan_in), 1/sqrt(fan_in)).
    Weight is returned transposed: shape (fan_in, fan_out)."""
    kw, kb = jax.random.split(key)
    bound = 1.0 / jnp.sqrt(jnp.float32(fan_in))
    w = jax.random.uniform(kw, (fan_in, fan_out), jnp.float32, -bound, bound)
    b = jax.random.uniform(kb, (1, fan_out), jnp.float32, -bound, bound)
    return w, b


if __name__ == "__main__":
    # small shapes consistent with the module's forward
    batch = 8
    num_inputs = 32       # envs.observation_space.shape[0]
    num_outputs = 4       # envs.action_space.n
    hidden_size = 256

    key = jax.random.PRNGKey(0)
    kx, kc1, kc2, ka1, ka2 = jax.random.split(key, 5)

    x = jax.random.normal(kx, (batch, num_inputs), jnp.float32)

    wc1, bc1 = init_linear(kc1, num_inputs, hidden_size)
    wc2, bc2 = init_linear(kc2, hidden_size, 1)
    wa1, ba1 = init_linear(ka1, num_inputs, hidden_size)
    wa2, ba2 = init_linear(ka2, hidden_size, num_outputs)

    fused = pack_params(wc1, bc1, wc2, bc2, wa1, ba1, wa2, ba2)

    probs, value = actor_critic_forward(x, fused, num_outputs)
    jax.block_until_ready((probs, value))

    # plain-JAX f32 reference (unfused, matches the torch module)
    hc = jnp.maximum(x @ wc1 + bc1, 0.0)
    value_ref = hc @ wc2 + bc2
    ha = jnp.maximum(x @ wa1 + ba1, 0.0)
    logits = ha @ wa2 + ba2
    probs_ref = jax.nn.softmax(logits, axis=1)

    assert probs.shape == (batch, num_outputs) and value.shape == (batch, 1)
    # Tolerances account for bf16 MXU operands (f32 accumulation) and the bf16
    # probs output; observed errors are ~1e-3, these bounds leave headroom.
    assert jnp.allclose(value, value_ref, atol=1e-2, rtol=1e-2)
    assert jnp.allclose(probs.astype(jnp.float32), probs_ref, atol=1e-2, rtol=1e-2)
    # probs computed with an exact f32 divide, then bf16-rounded: sum error is
    # bounded by num_actions half-ulps (~2e-3 worst case here).
    assert jnp.allclose(jnp.sum(probs.astype(jnp.float32), axis=1), 1.0, atol=5e-3)

    # TODO(synk): torch.distributions.Categorical has no Pallas equivalent;
    # the kernel returns the softmax probabilities that parameterize it.
    print("KERNEL_OK")
</pallas_src>

<mosaic_0001>
module attributes {stable_mosaic.version = 11 : i64} {
  func.func @actor_critic_kernel(%arg0: i32, %arg1: memref<8x32xf32, #tpu.memory_space<vmem>>, %arg2: memref<32x512xbf16, #tpu.memory_space<vmem>>, %arg3: memref<1x512xf32, #tpu.memory_space<vmem>>, %arg4: memref<512x128xbf16, #tpu.memory_space<vmem>>, %arg5: memref<1x128xf32, #tpu.memory_space<vmem>>, %arg6: memref<8x128xbf16, #tpu.memory_space<vmem>>, %arg7: memref<8x1xf32, #tpu.memory_space<vmem>>) attributes {dimension_semantics = [#tpu.dimension_semantics<parallel>], iteration_bounds = array<i64: 1>, scalar_prefetch = 0 : i64, scratch_operands = 0 : i64, tpu.core_type = #tpu.core_type<tc>, window_params = [{transform_indices = @transform_0, window_bounds = array<i64: 8, 32>}, {pipeline_mode = #tpu.pipeline_mode<synchronous>, transform_indices = @transform_1, window_bounds = array<i64: 32, 512>}, {pipeline_mode = #tpu.pipeline_mode<synchronous>, transform_indices = @transform_2, window_bounds = array<i64: 1, 512>}, {pipeline_mode = #tpu.pipeline_mode<synchronous>, transform_indices = @transform_3, window_bounds = array<i64: 512, 128>}, {pipeline_mode = #tpu.pipeline_mode<synchronous>, transform_indices = @transform_4, window_bounds = array<i64: 1, 128>}, {transform_indices = @transform_5, window_bounds = array<i64: 8, 128>}, {transform_indices = @transform_6, window_bounds = array<i64: 8, 1>}]} {
    %c0 = arith.constant 0 : index
    %c0_0 = arith.constant 0 : index
    %0 = vector.load %arg1[%c0, %c0_0] : memref<8x32xf32, #tpu.memory_space<vmem>>, vector<8x32xf32>
    %1 = arith.truncf %0 : vector<8x32xf32> to vector<8x32xbf16>
    %c0_1 = arith.constant 0 : index
    %c0_2 = arith.constant 0 : index
    %2 = vector.load %arg2[%c0_1, %c0_2] : memref<32x512xbf16, #tpu.memory_space<vmem>>, vector<32x512xbf16>
    %cst = arith.constant dense<0.000000e+00> : vector<8x512xf32>
    %3 = tpu.matmul %1, %2, %cst {dimension_numbers = #tpu.dot_dimension_numbers<[1], [0], [0], [1], [0, 0, 1, 1], [], []>} : vector<8x32xbf16>, vector<32x512xbf16>, vector<8x512xf32> -> vector<8x512xf32>
    %c0_3 = arith.constant 0 : index
    %c0_4 = arith.constant 0 : index
    %4 = vector.load %arg3[%c0_3, %c0_4] : memref<1x512xf32, #tpu.memory_space<vmem>>, vector<1x512xf32>
    %5 = vector.broadcast %4 : vector<1x512xf32> to vector<8x512xf32>
    %6 = arith.addf %3, %5 : vector<8x512xf32>
    %cst_5 = arith.constant 0.000000e+00 : f32
    %7 = vector.broadcast %cst_5 : f32 to vector<8x512xf32>
    %8 = arith.maximumf %6, %7 : vector<8x512xf32>
    %9 = arith.truncf %8 : vector<8x512xf32> to vector<8x512xbf16>
    %c0_6 = arith.constant 0 : index
    %c0_7 = arith.constant 0 : index
    %10 = vector.load %arg4[%c0_6, %c0_7] : memref<512x128xbf16, #tpu.memory_space<vmem>>, vector<512x128xbf16>
    %cst_8 = arith.constant dense<0.000000e+00> : vector<8x128xf32>
    %11 = tpu.matmul %9, %10, %cst_8 {dimension_numbers = #tpu.dot_dimension_numbers<[1], [0], [0], [1], [0, 0, 1, 1], [], []>} : vector<8x512xbf16>, vector<512x128xbf16>, vector<8x128xf32> -> vector<8x128xf32>
    %c0_9 = arith.constant 0 : index
    %c0_10 = arith.constant 0 : index
    %12 = vector.load %arg5[%c0_9, %c0_10] : memref<1x128xf32, #tpu.memory_space<vmem>>, vector<1x128xf32>
    %13 = vector.broadcast %12 : vector<1x128xf32> to vector<8x128xf32>
    %14 = arith.addf %11, %13 : vector<8x128xf32>
    %15 = tpu.iota {dimensions = array<i32: 1>} : vector<8x128xi32>
    %c4_i32 = arith.constant 4 : i32
    %16 = vector.broadcast %c4_i32 : i32 to vector<8x128xi32>
    %17 = arith.cmpi slt, %15, %16 : vector<8x128xi32>
    %cst_11 = arith.constant -1.000000e+30 : f32
    %18 = vector.broadcast %cst_11 : f32 to vector<8x128xf32>
    %19 = arith.select %17, %14, %18 : vector<8x128xi1>, vector<8x128xf32>
    %cst_12 = arith.constant dense<0xFF800000> : vector<8xf32>
    %20 = vector.multi_reduction <maximumf>, %19, %cst_12 [1] : vector<8x128xf32> to vector<8xf32>
    %21 = vector.shape_cast %20 : vector<8xf32> to vector<8x1xf32>
    %22 = vector.broadcast %21 : vector<8x1xf32> to vector<8x128xf32>
    %23 = arith.subf %19, %22 : vector<8x128xf32>
    %24 = math.exp %23 : vector<8x128xf32>
    %cst_13 = arith.constant dense<0.000000e+00> : vector<8xf32>
    %25 = vector.multi_reduction <add>, %24, %cst_13 [1] : vector<8x128xf32> to vector<8xf32>
    %26 = vector.shape_cast %25 : vector<8xf32> to vector<8x1xf32>
    %27 = vector.broadcast %26 : vector<8x1xf32> to vector<8x128xf32>
    %28 = arith.divf %24, %27 : vector<8x128xf32>
    %29 = arith.truncf %28 : vector<8x128xf32> to vector<8x128xbf16>
    %c0_14 = arith.constant 0 : index
    %c0_15 = arith.constant 0 : index
    %30 = vector.load %arg6[%c0_14, %c0_15] : memref<8x128xbf16, #tpu.memory_space<vmem>>, vector<8x128xbf16>
    tpu.vector_store %arg6[%c0_14, %c0_15], %29 {strides = array<i32>} : memref<8x128xbf16, #tpu.memory_space<vmem>>, vector<8x128xbf16>,
    %31 = vector.extract_strided_slice %14 {offsets = [0, 4], sizes = [8, 1], strides = [1, 1]} : vector<8x128xf32> to vector<8x1xf32>
    %c0_16 = arith.constant 0 : index
    %c0_17 = arith.constant 0 : index
    %32 = vector.load %arg7[%c0_16, %c0_17] : memref<8x1xf32, #tpu.memory_space<vmem>>, vector<8x1xf32>
    tpu.vector_store %arg7[%c0_16, %c0_17], %31 {strides = array<i32>} : memref<8x1xf32, #tpu.memory_space<vmem>>, vector<8x1xf32>,
    return
  }
  func.func @transform_0(%arg0: i32) -> (i32, i32) {
    %c0_i32 = arith.constant 0 : i32
    %c0_i32_0 = arith.constant 0 : i32
    return %arg0, %c0_i32 : i32, i32
  }
  func.func @transform_1(%arg0: i32) -> (i32, i32) {
    %c0_i32 = arith.constant 0 : i32
    %c0_i32_0 = arith.constant 0 : i32
    %c0_i32_1 = arith.constant 0 : i32
    return %c0_i32, %c0_i32_0 : i32, i32
  }
  func.func @transform_2(%arg0: i32) -> (i32, i32) {
    %c0_i32 = arith.constant 0 : i32
    %c0_i32_0 = arith.constant 0 : i32
    %c0_i32_1 = arith.constant 0 : i32
    return %c0_i32, %c0_i32_0 : i32, i32
  }
  func.func @transform_3(%arg0: i32) -> (i32, i32) {
    %c0_i32 = arith.constant 0 : i32
    %c0_i32_0 = arith.constant 0 : i32
    %c0_i32_1 = arith.constant 0 : i32
    return %c0_i32, %c0_i32_0 : i32, i32
  }
  func.func @transform_4(%arg0: i32) -> (i32, i32) {
    %c0_i32 = arith.constant 0 : i32
    %c0_i32_0 = arith.constant 0 : i32
    %c0_i32_1 = arith.constant 0 : i32
    return %c0_i32, %c0_i32_0 : i32, i32
  }
  func.func @transform_5(%arg0: i32) -> (i32, i32) {
    %c0_i32 = arith.constant 0 : i32
    %c0_i32_0 = arith.constant 0 : i32
    return %arg0, %c0_i32 : i32, i32
  }
  func.func @transform_6(%arg0: i32) -> (i32, i32) {
    %c0_i32 = arith.constant 0 : i32
    %c0_i32_0 = arith.constant 0 : i32
    return %arg0, %c0_i32 : i32, i32
  }
}

</mosaic_0001>

<bundles_post_ra>
// kernel: tpu_custom_call.1
= control target key start
LH: loop header
LB: loop body
LE: loop exit
PB: predicated region body
PF: predicated region fallthrough
CT: control target
= control target key end

     0   :  { %12 = vsyncpa [#allocation3], 0  ;;  %s989_s0 = inlined_call_operand.hbm [shape: f32[8,32], index: 0, kind: input, shape index: {}]   ;;  %s990_s1 = inlined_call_operand.hbm [shape: bf16[32,512], index: 1, kind: input, shape index: {}]   ;;  %s991_s2 = inlined_call_operand.hbm [shape: f32[1,512], index: 2, kind: input, shape index: {}]   ;;  %s992_s3 = inlined_call_operand.hbm [shape: bf16[512,128], index: 3, kind: input, shape index: {}]   ;;  %s993_s4 = inlined_call_operand.vmem [shape: f32[1,128], index: 4, kind: input, shape index: {}]   ;;  %s994_s5 = inlined_call_operand.hbm [shape: bf16[8,128], index: 5, kind: output, shape index: {0}]   ;;  %s995_s6 = inlined_call_operand.vmem [shape: f32[8,1], index: 6, kind: output, shape index: {1}]  }
   0x1   :  { %13 = vsyncpa [#allocation6], 0 }
   0x2   :  { %14 = vsyncpa [#allocation9], 0  ;;  %s31_s23 = sshll.u32 %s990_s1, 4  ;;  %s32_s23 = int_to_ptr.hbm [resolvable:$true] %s31_s23 }
   0x3   :  { %15 = vsyncpa [#allocation4], 0  ;;  %s923_s24 = smov [#allocation5]   ;;  %s21_s28 = sshll.u32 %s989_s0, 4  ;;  %s22_s28 = int_to_ptr.hbm [resolvable:$true] %s21_s28 }
   0x4   :  { %s33_s25 = sshll.u32 %s923_s24, 4  ;;  %s924_s29 = smov 256   ;;  %s34_s25 = int_to_ptr.vmem [resolvable:$true] %s33_s25 }
   0x5   :  { %s925_s30 = smov 16   ;;  %s926_s7 = smov [#allocation2]  }
   0x6   :  { %39 = dma.hbm_to_vmem [thread:$0]  %s32_s23, 1024, %s34_s25, [#allocation6], %s924_s29, %s924_s29, %s925_s30  }
   0x7   :  { %s23_s8 = sshll.u32 %s926_s7, 4  ;;  %s45_s11 = sshll.u32 %s991_s2, 4  ;;  %s24_s8 = int_to_ptr.vmem [resolvable:$true] %s23_s8  ;;  %s46_s11 = int_to_ptr.hbm [resolvable:$true] %s45_s11 }
   0x8   :  { %26 = dma.hbm_to_vmem [thread:$0]  %s22_s28, 128, %s24_s8, [#allocation3]  }
   0x9   :  { %s55_s13 = sshll.u32 %s992_s3, 4  ;;  %s927_s14 = smov [#allocation7]   ;;  %s56_s13 = int_to_ptr.hbm [resolvable:$true] %s55_s13 }
   0xa   :  { %s47_s15 = sshll.u32 %s927_s14, 4  ;;  %s928_s0 = smov [#allocation8]   ;;  %s48_s15 = int_to_ptr.vmem [resolvable:$true] %s47_s15 }
   0xb   :  { %50 = dma.hbm_to_vmem [thread:$0]  %s46_s11, 64, %s48_s15, [#allocation6]  }
   0xc   :  { %s57_s16 = sshll.u32 %s928_s0, 4  ;;  %s929_s17 = smov 64   ;;  %s58_s16 = int_to_ptr.vmem [resolvable:$true] %s57_s16 }
   0xd   :  { %s930_s18 = smov 4  }
   0xe   :  { %63 = dma.hbm_to_vmem [thread:$0]  %s56_s13, 4096, %s58_s16, [#allocation9], %s929_s17, %s929_s17, %s930_s18  }
   0xf   :  { %915 = dma.done.wait [#allocation3], 128  }
  0x10   :  { %916 = vsyncadd [#allocation3], 4294967168 }
  0x11   :  { %917 = dma.done.wait [#allocation6], 1088  }
  0x12   :  { %918 = vsyncadd [#allocation6], 4294966208 }
  0x13   :  { %919 = dma.done.wait [#allocation9], 4096  }
  0x14   :  { %920 = vsyncadd [#allocation9], 4294963200  ;;  %v594_v0 = vld [vmem:[#allocation5 + $0x20] sm:$0xf]  ;;  %v746_v1 = vld [vmem:[#allocation5 + $0x2c] sm:$0xf0] }
  0x15   :  { %v602_v2 = vld [vmem:[#allocation5 + $0x28] sm:$0xf]  ;;  %v595_v3 = vor.u32 %v746_v1, %v594_v0  ;;  %v747_v4 = vld [vmem:[#allocation5 + $0x34] sm:$0xf0]  ;;  %v745_v5 = vld [vmem:[#allocation5 + $0x2c] sm:$0xf] }
  0x16   :  { %v604_v6 = vld [vmem:[#allocation5 + $0x38] sm:$0xf0]  ;;  %v603_v7 = vor.u32 %v747_v4, %v602_v2  ;;  %v744_v9 = vld [vmem:[#allocation5 + $0x24] sm:$0xf]  ;;  %v596_v10 = vld [vmem:[#allocation5 + $0x30] sm:$0xf0] }
  0x17   :  { %v607_v8 = vor.u32 %v745_v5, %v604_v6  ;;  %v578_v11 = vld [vmem:[#allocation5] sm:$0xf]  ;;  %153 = vmatpush.bf16.msra.mxu0 %v595_v3  ;;  %v599_v12 = vor.u32 %v744_v9, %v596_v10  ;;  %v742_v13 = vld [vmem:[#allocation5 + $0xc] sm:$0xf0]  ;;  %v586_v14 = vld [vmem:[#allocation5 + $0x8] sm:$0xf] }
  0x18   :  { %v743_v15 = vld [vmem:[#allocation5 + $0x14] sm:$0xf0]  ;;  %179 = vmatpush.bf16.msra.mxu2 %v603_v7  ;;  %v579_v16 = vor.u32 %v742_v13, %v578_v11  ;;  %v741_v18 = vld [vmem:[#allocation5 + $0xc] sm:$0xf]  ;;  %v588_v19 = vld [vmem:[#allocation5 + $0x18] sm:$0xf0] }
  0x19   :  { %192 = vmatpush.bf16.msra.mxu3 %v607_v8  ;;  %v587_v17 = vor.u32 %v743_v15, %v586_v14  ;;  %v740_v20 = vld [vmem:[#allocation5 + $0x4] sm:$0xf]  ;;  %166 = vmatpush.bf16.msra.mxu1 %v599_v12  ;;  %v591_v21 = vor.u32 %v741_v18, %v588_v19  ;;  %v580_v22 = vld [vmem:[#allocation5 + $0x10] sm:$0xf0]  ;;  %v83_v23 = vld [vmem:[#allocation2] sm:$0xff]  ;;  %vm143_vm0 = vcmask 261120  }
  0x1a   :  { %v755_v24 = vld [vmem:[#allocation8 + $0x38] sm:$0xff]  ;;  %v583_v25 = vor.u32 %v740_v20, %v580_v22  ;;  %v84_v26 = vpack.c.bf16 %v83_v23, %v83_v23  ;;  %v754_v29 = vld [vmem:[#allocation8 + $0x30] sm:$0xff]  ;;  %v753_v33 = vld [vmem:[#allocation8 + $0x28] sm:$0xff]  ;;  %v519_v23 = vlaneseq  ;;  %s931_s19 = smov 124   ;;  %vm551_vm2 = vcmask 7168   ;;  %s560_s24 = sshll.u32 %s994_s5, 4  ;;  %s561_s24 = int_to_ptr.hbm [resolvable:$true] %s560_s24 }
  0x1b   :  { %v763_v27 = vld [vmem:[#allocation8 + $0x78] sm:$0xff]  ;;  %154 = vmatpush.bf16.msra.mxu0 %v579_v16  ;;  %v762_v31 = vld [vmem:[#allocation8 + $0x70] sm:$0xff]  ;;  %v761_v35 = vld [vmem:[#allocation8 + $0x68] sm:$0xff] }
  0x1c   :  { %180 = vmatpush.bf16.msra.mxu2 %v587_v17  ;;  %v771_v28 = vld [vmem:[#allocation8 + $0xb8] sm:$0xff]  ;;  %v770_v32 = vld [vmem:[#allocation8 + $0xb0] sm:$0xff]  ;;  %v769_v36 = vld [vmem:[#allocation8 + $0xa8] sm:$0xff] }
  0x1d   :  { %193 = vmatpush.bf16.msra.mxu3 %v591_v21  ;;  %167 = vmatpush.bf16.msra.mxu1 %v583_v25  ;;  %v779_v30 = vld [vmem:[#allocation8 + $0xf8] sm:$0xff]  ;;  %v778_v34 = vld [vmem:[#allocation8 + $0xf0] sm:$0xff]  ;;  %v752_v37 = vld [vmem:[#allocation8 + $0x20] sm:$0xff] }
  0x1e   :  { %608 = vmatmul.msk.bf16.vlgmr.msra.gmra.mxu0 %vm143_vm0, %v84_v26  ;;  %v777_v38 = vld [vmem:[#allocation8 + $0xe8] sm:$0xff]  ;;  %v760_v39 = vld [vmem:[#allocation8 + $0x60] sm:$0xff]  ;;  %v751_v41 = vld [vmem:[#allocation8 + $0x18] sm:$0xff] }
  0x1f   :  { %467 = vmatpush.bf16.msrb.mxu0 %v755_v24  ;;  %610 = vmatmul.msk.bf16.vlgmr.msra.gmra.mxu2 %vm143_vm0, %v84_v26  ;;  %v768_v40 = vld [vmem:[#allocation8 + $0xa0] sm:$0xff]  ;;  %v759_v43 = vld [vmem:[#allocation8 + $0x58] sm:$0xff]  ;;  %v750_v45 = vld [vmem:[#allocation8 + $0x10] sm:$0xff] }
  0x20   :  { %611 = vmatmul.msk.bf16.vlgmr.msra.gmra.mxu3 %vm143_vm0, %v84_v26  ;;  %609 = vmatmul.msk.bf16.vlgmr.msra.gmra.mxu1 %vm143_vm0, %v84_v26  ;;  %v776_v42 = vld [vmem:[#allocation8 + $0xe0] sm:$0xff]  ;;  %v767_v44 = vld [vmem:[#allocation8 + $0x98] sm:$0xff]  ;;  %v758_v47 = vld [vmem:[#allocation8 + $0x50] sm:$0xff] }
  0x21   :  { %480 = vmatpush.bf16.msrb.mxu1 %v763_v27  ;;  %493 = vmatpush.bf16.msrb.mxu2 %v771_v28  ;;  %v775_v46 = vld [vmem:[#allocation8 + $0xd8] sm:$0xff]  ;;  %v749_v48 = vld [vmem:[#allocation8 + $0x8] sm:$0xff]  ;;  %v766_v50 = vld [vmem:[#allocation8 + $0x90] sm:$0xff]  ;;  %v520_v27 = vand.u32 127, %v519_v23 }
  0x22   :  { %506 = vmatpush.bf16.msrb.mxu3 %v779_v30  ;;  %v757_v49 = vld [vmem:[#allocation8 + $0x48] sm:$0xff]  ;;  %v774_v51 = vld [vmem:[#allocation8 + $0xd0] sm:$0xff]  ;;  %v748_v52 = vld [vmem:[#allocation8] sm:$0xff] }
  0x23   :  { %468 = vmatpush.bf16.msrb.mxu0 %v754_v29  ;;  %v756_v53 = vld [vmem:[#allocation8 + $0x40] sm:$0xff]  ;;  %v765_v54 = vld [vmem:[#allocation8 + $0x88] sm:$0xff]  ;;  %v93_v58 = vld [vmem:[#allocation7] sm:$0xf]  ;;  %vm521_vm1 = vcmp.lt.s32.totalorder %v520_v27, 4 }
  0x24   :  { %v773_v55 = vld [vmem:[#allocation8 + $0xc8] sm:$0xff]  ;;  %v764_v56 = vld [vmem:[#allocation8 + $0x80] sm:$0xff]  ;;  %v95_v59 = vperm.slane %v93_v58, 0  ;;  %v96_v60 = vperm.slane %v93_v58, 1  ;;  %v97_v2 = vperm.slane %v93_v58, 2  ;;  %v98_v3 = vperm.slane %v93_v58, 3 }
  0x25   :  { %481 = vmatpush.bf16.msrb.mxu1 %v762_v31  ;;  %494 = vmatpush.bf16.msrb.mxu2 %v770_v32  ;;  %v772_v57 = vld [vmem:[#allocation8 + $0xc0] sm:$0xff]  ;;  %v790_v20 = vld [vmem:[%s993_s4] ss:$0 sm:$0xff] }
  0x26   :  { %507 = vmatpush.bf16.msrb.mxu3 %v778_v34 }
  0x27   :  { %469 = vmatpush.bf16.msrb.mxu0 %v753_v33 }
  0x29   :  { %482 = vmatpush.bf16.msrb.mxu1 %v761_v35  ;;  %495 = vmatpush.bf16.msrb.mxu2 %v769_v36 }
  0x2a   :  { %508 = vmatpush.bf16.msrb.mxu3 %v777_v38 }
  0x2b   :  { %470 = vmatpush.bf16.msrb.mxu0 %v752_v37 }
  0x2d   :  { %483 = vmatpush.bf16.msrb.mxu1 %v760_v39  ;;  %496 = vmatpush.bf16.msrb.mxu2 %v768_v40 }
  0x2e   :  { %509 = vmatpush.bf16.msrb.mxu3 %v776_v42 }
  0x2f   :  { %471 = vmatpush.bf16.msrb.mxu0 %v751_v41 }
  0x31   :  { %484 = vmatpush.bf16.msrb.mxu1 %v759_v43  ;;  %497 = vmatpush.bf16.msrb.mxu2 %v767_v44 }
  0x32   :  { %510 = vmatpush.bf16.msrb.mxu3 %v775_v46 }
  0x33   :  { %472 = vmatpush.bf16.msrb.mxu0 %v750_v45 }
  0x35   :  { %485 = vmatpush.bf16.msrb.mxu1 %v758_v47  ;;  %498 = vmatpush.bf16.msrb.mxu2 %v766_v50 }
  0x36   :  { %511 = vmatpush.bf16.msrb.mxu3 %v774_v51 }
  0x37   :  { %473 = vmatpush.bf16.msrb.mxu0 %v749_v48 }
  0x39   :  { %486 = vmatpush.bf16.msrb.mxu1 %v757_v49  ;;  %499 = vmatpush.bf16.msrb.mxu2 %v765_v54 }
  0x3a   :  { %512 = vmatpush.bf16.msrb.mxu3 %v773_v55 }
  0x3b   :  { %474 = vmatpush.bf16.msrb.mxu0 %v748_v52 }
  0x3d   :  { %487 = vmatpush.bf16.msrb.mxu1 %v756_v53  ;;  %500 = vmatpush.bf16.msrb.mxu2 %v764_v56 }
  0x3e   :  { %513 = vmatpush.bf16.msrb.mxu3 %v772_v57 }
  0x9b   :  { %v156_v61 = vpop.f32.mrf.mxu0 }
  0x9c   :  { %v157_v62 = vadd.f32 %v156_v61, %v95_v59 }
  0x9d   :  { %v169_v63 = vpop.f32.mrf.mxu1 }
  0x9e   :  { %v199_v0 = vmax.f32 %v157_v62, 0.0  ;;  %v170_v1 = vadd.f32 %v169_v63, %v96_v60 }
  0xa0   :  { %v203_v4 = vpack.c.bf16 %v199_v0, %v199_v0  ;;  %v200_v5 = vmax.f32 %v170_v1, 0.0 }
  0xa2   :  { %v204_v6 = vpack.c.bf16 %v200_v5, %v200_v5  ;;  %v182_v7 = vpop.f32.mrf.mxu2  ;;  %475 = vmatmul.bf16.vlgmr.msrb.gmra.mxu0 %v203_v4 }
  0xa3   :  { %v195_v8 = vpop.f32.mrf.mxu3  ;;  %v183_v9 = vadd.f32 %v182_v7, %v97_v2  ;;  %v158_v11 = vpop.f32.mrf.mxu0 }
  0xa4   :  { %v196_v10 = vadd.f32 %v195_v8, %v98_v3  ;;  %488 = vmatmul.bf16.vlgmr.msrb.gmra.mxu1 %v204_v6 }
  0xa5   :  { %v201_v12 = vmax.f32 %v183_v9, 0.0  ;;  %v171_v14 = vpop.f32.mrf.mxu1 }
  0xa6   :  { %v202_v13 = vmax.f32 %v196_v10, 0.0 }
  0xa7   :  { %v205_v15 = vpack.c.bf16 %v201_v12, %v201_v12 }
  0xa8   :  { %v206_v16 = vpack.c.bf16 %v202_v13, %v202_v13 }
  0xa9   :  { %501 = vmatmul.bf16.vlgmr.msrb.gmra.mxu2 %v205_v15 }
  0xaa   :  { %514 = vmatmul.bf16.vlgmr.msrb.gmra.mxu3 %v206_v16  ;;  %v184_v17 = vpop.f32.mrf.mxu2 }
  0xab   :  { %v197_v18 = vpop.f32.mrf.mxu3 }
 0x11f   :  { %v476_v19 = vpop.f32.mrf.mxu0 }
 0x120   :  { %v477_v22 = vadd.f32 %v790_v20, %v476_v19 }
 0x121   :  { %v489_v21 = vpop.f32.mrf.mxu1 }
 0x122   :  { %v490_v25 = vadd.f32 %v489_v21, %v477_v22 }
 0x127   :  { %v478_v24 = vpop.f32.mrf.mxu0 }
 0x129   :  { %v491_v26 = vpop.f32.mrf.mxu1 }
 0x12c   :  { %v502_v28 = vpop.f32.mrf.mxu2 }
 0x12d   :  { %v515_v29 = vpop.f32.mrf.mxu3  ;;  %v503_v30 = vadd.f32 %v502_v28, %v490_v25 }
 0x12f   :  { %v516_v31 = vadd.f32 %v515_v29, %v503_v30 }
 0x131   :  { %548 = vrot.lane.b32.xlu1 %v516_v31, %s931_s19  ;;  %v522_v32 = vsel %vm521_vm1, %v516_v31, -1e+30 }
 0x132   :  { %523 = vmax.xlane.f32.xlu0 %v522_v32 }
 0x134   :  { %v504_v33 = vpop.f32.mrf.mxu2 }
 0x135   :  { %v517_v34 = vpop.f32.mrf.mxu3 }
 0x1a3   :  { %v549_v35 = vpop.permute.xlu1 %548 }
 0x1a4   :  { %552 = vst.msk [vmem:[%s995_s6] sm:$0xff] %vm551_vm2, %v549_v35  ;;  %s932_s6 = smov [#allocation10]  }
 0x1a5   :  { %v524_v36 = vpop.xlane.xlu0 %523  ;;  %s558_s21 = sshll.u32 %s932_s6, 4  ;;  %s559_s21 = int_to_ptr.vmem [resolvable:$true] %s558_s21 }
 0x1a6   :  { %v525_v37 = vsub.f32 %v522_v32, %v524_v36 }
 0x1a8   :  { %v526_v38 = vmul.f32 1.442695, %v525_v37 }
 0x1aa   :  { %791 = vpow2.f32 %v526_v38 }
 0x1b0   :  { %v792_v39 = vpop.eup %791 }
 0x1b1   :  { %528 = vadd.xlane.f32.xlu0 %v792_v39 }
 0x224   :  { %v529_v40 = vpop.xlane.xlu0 %528 }
 0x225   :  { %793 = vrcp.f32 %v529_v40  ;;  %v541_v44 = vand.u32 2147483648, %v529_v40  ;;  %v539_v46 = vand.u32 2147483647, %v529_v40  ;;  %vm535_vm4 = vweird.f32 %v529_v40 }
 0x227   :  { %v542_v48 = vor.u32 1.1754944e-38, %v541_v44  ;;  %vm540_vm6 = vcmp.eq.f32.partialorder %v539_v46, 8.507059e+37 }
 0x22b   :  { %v794_v41 = vpop.eup %793 }
 0x22c   :  { %v531_v42 = vmul.f32 %v794_v41, %v529_v40  ;;  %vm536_vm3 = vweird.f32 %v794_v41 }
 0x22d   :  { %vm537_vm5 = vmor %vm535_vm4, %vm536_vm3 }
 0x22e   :  { %v532_v43 = vsub.f32 1.0, %v531_v42 }
 0x230   :  { %v533_v45 = vmul.f32 %v794_v41, %v532_v43 }
 0x232   :  { %v534_v47 = vadd.f32 %v794_v41, %v533_v45 }
 0x234   :  { %v538_v49 = vsel %vm537_vm5, %v794_v41, %v534_v47 }
 0x235   :  { %v543_v50 = vsel %vm540_vm6, %v542_v48, %v538_v49 }
 0x236   :  { %v544_v51 = vmul.f32 %v792_v39, %v543_v50 }
 0x238   :  { %v545_v52 = vpack.c.bf16 %v544_v51, %v544_v51 }
 0x23a   :  { %546 = vst [vmem:[#allocation10] sm:$0xf] %v545_v52 }
 0x23b   :  { %563 = dma.vmem_to_hbm [thread:$0]  %s559_s21, 64, %s561_s24, [#allocation4]  }
 0x23c   :  { %921 = dma.done.wait [#allocation4], 64  }
 0x23d   :  { %922 = vsyncadd [#allocation4], 4294967232 }
 0x23e   :  { %572 = vsyncpa [#allocation3], 1 }
 0x23f   :  { %573 = vsyncpa [#allocation6], 1 }
 0x240   :  { %574 = vsyncpa [#allocation9], 1 }
 0x241   :  { %575 = vsyncpa [#allocation4], 1 }

</bundles_post_ra>
